<compile_context>
chip_gen: v5e
topology: v5e:2x2
jax: 0.10.0
libtpu: 0.0.40
codegen_flags: <defaults>
</compile_context>

<pallas_src>
import jax
import jax.numpy as jnp
from jax.experimental import pallas as pl
from jax.experimental.pallas import tpu as pltpu


def _linear_kernel(x_ref, w_ref, b_ref, o_ref):
    # out = x @ w + b  (MXU matmul with f32 accumulation, VPU bias add)
    acc = jnp.dot(x_ref[...], w_ref[...], preferred_element_type=jnp.float32)
    o_ref[...] = (acc + b_ref[...]).astype(o_ref.dtype)


def action_network_forward(recurrent_hidden, weight_t, bias):
    """Single-call path. recurrent_hidden: [B, H]; weight_t: [H, O]; bias: [O] -> [B, O]."""
    B, H = recurrent_hidden.shape
    H2, O = weight_t.shape
    assert H == H2 and bias.shape == (O,)
    bias_2d = bias.reshape(1, O)  # lane-aligned broadcast row

    # No grid: a single invocation on full-array VMEM blocks — the whole problem
    # (~3 KB of operands) fits trivially; any tiling would be pure overhead.
    return pl.pallas_call(
        _linear_kernel,
        out_shape=jax.ShapeDtypeStruct((B, O), recurrent_hidden.dtype),
        in_specs=[
            pl.BlockSpec(memory_space=pltpu.MemorySpace.VMEM),
            pl.BlockSpec(memory_space=pltpu.MemorySpace.VMEM),
            pl.BlockSpec(memory_space=pltpu.MemorySpace.VMEM),
        ],
        out_specs=pl.BlockSpec(memory_space=pltpu.MemorySpace.VMEM),
    )(recurrent_hidden, weight_t, bias_2d)


def action_network_forward_batched(x_rows, weight_t, bias, *, tile_rows=128):
    """Batched-rollout path: x_rows is [N, H] (e.g. num_steps*B flattened rows).

    One pipelined kernel over all rows; weight/bias stay VMEM-resident across the
    grid, and the output is written as a lane-dense [tile_rows, 128-padded] slab.
    """
    N, H = x_rows.shape
    H2, O = weight_t.shape
    assert H == H2 and bias.shape == (O,)

    # Lane-dense output: pad the output feature dim up to a multiple of 128 so each
    # tile store is an unmasked full-lane vst instead of a masked partial store.
    O_pad = max(128, ((O + 127) // 128) * 128)
    w_pad = jnp.zeros((H, O_pad), weight_t.dtype).at[:, :O].set(weight_t)
    b_pad = jnp.zeros((1, O_pad), bias.dtype).at[:, :O].set(bias.reshape(1, O))

    # Pad rows so the grid divides evenly (zero rows are sliced away afterwards).
    n_tiles = (N + tile_rows - 1) // tile_rows
    N_pad = n_tiles * tile_rows
    x_pad = x_rows if N_pad == N else jnp.zeros((N_pad, H), x_rows.dtype).at[:N].set(x_rows)

    out = pl.pallas_call(
        _linear_kernel,
        out_shape=jax.ShapeDtypeStruct((N_pad, O_pad), x_rows.dtype),
        grid=(n_tiles,),
        in_specs=[
            pl.BlockSpec((tile_rows, H), lambda i: (i, 0)),  # per-step row tile
            pl.BlockSpec((H, O_pad), lambda i: (0, 0)),      # weight: VMEM-resident
            pl.BlockSpec((1, O_pad), lambda i: (0, 0)),      # bias: VMEM-resident
        ],
        out_specs=pl.BlockSpec((tile_rows, O_pad), lambda i: (i, 0)),
        compiler_params=pltpu.CompilerParams(
            # Rows are independent: shard across the 2 TensorCores on v7x
            # (no-op on v5e/v6e, which have a single TC).
            dimension_semantics=("parallel",),
        ),
    )(x_pad, w_pad, b_pad)
    return out[:N, :O]


if __name__ == "__main__":
    # Small shapes consistent with the module: batch=8, recurrent_hid_dim=32, output_dim=16
    B, H, O = 8, 32, 16
    key = jax.random.PRNGKey(0)
    k_x, k_w, k_b, k_xs = jax.random.split(key, 4)

    recurrent_hidden = jax.random.normal(k_x, (B, H), dtype=jnp.float32)

    # Deterministic parameter init (mimics nn.Linear uniform(-1/sqrt(H), 1/sqrt(H)))
    bound = 1.0 / jnp.sqrt(jnp.float32(H))
    weight = jax.random.uniform(k_w, (O, H), minval=-bound, maxval=bound, dtype=jnp.float32)
    bias = jax.random.uniform(k_b, (O,), minval=-bound, maxval=bound, dtype=jnp.float32)
    weight_t = weight.T  # [H, O] so the kernel is a plain row-major matmul

    # --- single-call path (matches one module forward) ---
    logits = action_network_forward(recurrent_hidden, weight_t, bias)
    jax.block_until_ready(logits)
    ref = recurrent_hidden @ weight.T + bias
    assert jnp.allclose(logits, ref, atol=1e-5, rtol=1e-5), "single-call mismatch vs reference"

    # --- batched-rollout path (many timesteps in one pipelined kernel) ---
    num_steps = 16
    x_steps = jax.random.normal(k_xs, (num_steps * B, H), dtype=jnp.float32)
    logits_steps = action_network_forward_batched(x_steps, weight_t, bias, tile_rows=64)
    jax.block_until_ready(logits_steps)
    ref_steps = x_steps @ weight.T + bias
    assert jnp.allclose(logits_steps, ref_steps, atol=1e-5, rtol=1e-5), "batched mismatch vs reference"

    print("KERNEL_OK")
</pallas_src>

<mosaic_0001>
module attributes {stable_mosaic.version = 11 : i64} {
  func.func @_linear_kernel(%arg0: memref<8x32xf32, #tpu.memory_space<vmem>>, %arg1: memref<32x16xf32, #tpu.memory_space<vmem>>, %arg2: memref<1x16xf32, #tpu.memory_space<vmem>>, %arg3: memref<8x16xf32, #tpu.memory_space<vmem>>) attributes {dimension_semantics = [], scalar_prefetch = 0 : i64, scratch_operands = 0 : i64, tpu.core_type = #tpu.core_type<tc>} {
    %c0 = arith.constant 0 : index
    %c0_0 = arith.constant 0 : index
    %0 = vector.load %arg0[%c0, %c0_0] : memref<8x32xf32, #tpu.memory_space<vmem>>, vector<8x32xf32>
    %c0_1 = arith.constant 0 : index
    %c0_2 = arith.constant 0 : index
    %1 = vector.load %arg1[%c0_1, %c0_2] : memref<32x16xf32, #tpu.memory_space<vmem>>, vector<32x16xf32>
    %cst = arith.constant dense<0.000000e+00> : vector<8x16xf32>
    %2 = tpu.matmul %0, %1, %cst {dimension_numbers = #tpu.dot_dimension_numbers<[1], [0], [0], [1], [0, 0, 1, 1], [], []>} : vector<8x32xf32>, vector<32x16xf32>, vector<8x16xf32> -> vector<8x16xf32>
    %c0_3 = arith.constant 0 : index
    %c0_4 = arith.constant 0 : index
    %3 = vector.load %arg2[%c0_3, %c0_4] : memref<1x16xf32, #tpu.memory_space<vmem>>, vector<1x16xf32>
    %4 = vector.broadcast %3 : vector<1x16xf32> to vector<8x16xf32>
    %5 = arith.addf %2, %4 : vector<8x16xf32>
    %c0_5 = arith.constant 0 : index
    %c0_6 = arith.constant 0 : index
    %6 = vector.load %arg3[%c0_5, %c0_6] : memref<8x16xf32, #tpu.memory_space<vmem>>, vector<8x16xf32>
    tpu.vector_store %arg3[%c0_5, %c0_6], %5 {strides = array<i32>} : memref<8x16xf32, #tpu.memory_space<vmem>>, vector<8x16xf32>,
    return
  }
}

</mosaic_0001>

<bundles_post_ra>
// kernel: tpu_custom_call.1
= control target key start
LH: loop header
LB: loop body
LE: loop exit
PB: predicated region body
PF: predicated region fallthrough
CT: control target
= control target key end

     0   :  { %s137_s0 = inlined_call_operand.vmem [shape: f32[8,32], index: 0, kind: input, shape index: {}]   ;;  %s138_s1 = inlined_call_operand.vmem [shape: f32[32,16], index: 1, kind: input, shape index: {}]   ;;  %s139_s2 = inlined_call_operand.vmem [shape: f32[1,16], index: 2, kind: input, shape index: {}]   ;;  %s140_s3 = inlined_call_operand.hbm [shape: f32[8,16], index: 3, kind: output, shape index: {}]  }
   0x1   :  { %v19_v0 = vld [vmem:[%s138_s1 + $0x18] sm:$0xff]  ;;  %v18_v1 = vld [vmem:[%s138_s1 + $0x10] sm:$0xff]  ;;  %v17_v2 = vld [vmem:[%s138_s1 + $0x8] sm:$0xff] }
   0x2   :  { %40 = vmatpush.msra.mxu0 %v19_v0 }
   0x3   :  { %8 = vsyncpa [#allocation3], 0  ;;  %v16_v3 = vld [vmem:[%s138_s1] sm:$0xff]  ;;  %vm24_vm0 = vcmask 261120   ;;  %s95_s24 = smov [#allocation2]   ;;  %s57_s28 = sshll.u32 %s140_s3, 4  ;;  %s58_s28 = int_to_ptr.hbm [resolvable:$true] %s57_s28 }
   0x4   :  { %41 = vmatpush.msra.mxu0 %v18_v1  ;;  %v15_v4 = vld [vmem:[%s137_s0] sm:$0xff]  ;;  %s55_s25 = sshll.u32 %s95_s24, 4  ;;  %vm48_vm1 = vcmask 130048   ;;  %s56_s25 = int_to_ptr.vmem [resolvable:$true] %s55_s25 }
   0x5   :  { %v68_v5 = vld [vmem:[%s139_s2] ss:$0 sm:$0xff] }
   0x6   :  { %42 = vmatpush.msra.mxu0 %v17_v2 }
   0x8   :  { %43 = vmatpush.msra.mxu0 %v16_v3 }
   0x9   :  { %66 = vmatmul.msk.f32.vlgmr.msra.gmra.mxu0 %vm24_vm0, %v15_v4 }
  0x86   :  { %v45_v6 = vpop.f32.mrf.mxu0 }
  0x87   :  { %v46_v7 = vadd.f32 %v68_v5, %v45_v6 }
  0x89   :  { %49 = vst.msk [vmem:[#allocation2] sm:$0xff] %vm48_vm1, %v46_v7 }
  0x8a   :  { %60 = dma.vmem_to_hbm [thread:$0]  %s56_s25, 128, %s58_s28, [#allocation3]  }
  0x8b   :  { %93 = dma.done.wait [#allocation3], 128  }
  0x8c   :  { %94 = vsyncadd [#allocation3], 4294967168 }
  0x8d   :  { %65 = vsyncpa [#allocation3], 1 }

</bundles_post_ra>
